<compile_context>
chip_gen: v7x
topology: tpu7x:2x2x1
jax: 0.10.0
libtpu: 0.0.40
codegen_flags: <defaults>
</compile_context>

<pallas_src>
import functools

import jax
import jax.numpy as jnp
import numpy as np
from jax.experimental import pallas as pl
from jax.experimental.pallas import tpu as pltpu

_FWD_ORDER = ('w1', 'w2', 'wh1', 'wh2', 'biases')


def _round_up(x, m):
    return -(-x // m) * m


# --------------------------------------------------------------------------- kernel
def _neural_kernel(x_ref, w1_ref, w2_ref, wh1_ref, wh2_ref, bias_ref, out_ref):
    """One (net, batch-block) grid step: 4 MXU matmuls; bias / ReLU stay in f32.

    x     : (Bb, D_in) f32   (batch rows already reversed in the wrapper -> rot90 done)
    w*    : bf16 weights stored (in, out)
    bias  : (1, 512 + 256 + hid + na_pad) f32 packed, 128-lane-aligned segments
    out   : (Bb, na_pad) f32, lane-dense (na_pad is a multiple of 128)
    """
    bf16 = jnp.bfloat16
    f1 = w1_ref.shape[1]            # 512
    f2 = w2_ref.shape[1]            # 256
    fh = wh1_ref.shape[1]           # 128 * (n_branches + 1)
    fo = wh2_ref.shape[1]           # na_pad

    b1 = bias_ref[:, 0:f1]
    b2 = bias_ref[:, f1:f1 + f2]
    bh1 = bias_ref[:, f1 + f2:f1 + f2 + fh]
    bh2 = bias_ref[:, f1 + f2 + fh:f1 + f2 + fh + fo]

    x = x_ref[...].astype(bf16)

    # shared trunk: Linear -> ReLU -> Linear
    h1 = jnp.dot(x, w1_ref[...], preferred_element_type=jnp.float32) + b1
    h1 = jnp.maximum(h1, 0.0).astype(bf16)
    shared = jnp.dot(h1, w2_ref[...], preferred_element_type=jnp.float32) + b2
    shared = shared.astype(bf16)

    # fused heads, layer 1 (all branch heads + state-value head in one wide matmul)
    hh = jnp.dot(shared, wh1_ref[...], preferred_element_type=jnp.float32) + bh1
    hh = jnp.maximum(hh, 0.0).astype(bf16)

    # fused heads, layer 2: block-diagonal weight pre-composed with the dueling-combine matrix
    # at init, so this single matmul emits  adv - mean(adv over branches) + state  directly.
    out_ref[...] = (jnp.dot(hh, wh2_ref[...], preferred_element_type=jnp.float32)
                    + bh2).astype(out_ref.dtype)


# --------------------------------------------------------------------------- pallas wrapper
def _pallas_forward(x, fwd, *, net, n_branches, act_dim):
    """net=None -> run both stacked networks (net grid axis of 2); net in {0,1} -> that one."""
    B, d_in = x.shape
    na = n_branches * act_dim
    f1 = fwd['w1'].shape[-1]
    f2 = fwd['w2'].shape[-1]
    hid = fwd['wh1'].shape[-1]
    na_pad = fwd['wh2'].shape[-1]
    tot_bias = fwd['biases'].shape[-1]
    n_nets = 2 if net is None else 1

    # Fold torch .rot90(1,[0,1]) (batch reversal) into the input: the network is row-wise,
    # so reversed input rows give bit-identical reversed output rows.
    x = x[::-1]

    # Batch tiling: fill MXU rows on large batches; single block otherwise.
    if B % 256 == 0:
        block_b = 256
    elif B % 128 == 0:
        block_b = 128
    else:
        block_b = B
    n_bblk = B // block_b

    def pidx(m, b):  # weight / bias index map: constant in the batch axis -> stays VMEM-resident
        return (m if net is None else net, 0, 0)

    in_specs = [
        pl.BlockSpec((block_b, d_in), lambda m, b: (b, 0)),
        pl.BlockSpec((None, d_in, f1), pidx),
        pl.BlockSpec((None, f1, f2), pidx),
        pl.BlockSpec((None, f2, hid), pidx),
        pl.BlockSpec((None, hid, na_pad), pidx),
        pl.BlockSpec((None, 1, tot_bias), pidx),
    ]
    out_specs = pl.BlockSpec((None, block_b, na_pad), lambda m, b: (m, b, 0))

    flops = int(2 * n_nets * B * (d_in * f1 + f1 * f2 + f2 * hid + hid * na_pad))
    weight_bytes = sum(int(np.prod(fwd[k].shape[1:])) * fwd[k].dtype.itemsize
                       for k in _FWD_ORDER if k != 'biases') + tot_bias * 4
    cost = pl.CostEstimate(
        flops=flops,
        transcendentals=0,
        bytes_accessed=int(n_nets * weight_bytes
                           + n_nets * x.size * x.dtype.itemsize
                           + n_nets * B * na_pad * 4))

    out = pl.pallas_call(
        _neural_kernel,
        out_shape=jax.ShapeDtypeStruct((n_nets, B, na_pad), jnp.float32),
        grid=(n_nets, n_bblk),
        in_specs=in_specs,
        out_specs=out_specs,
        # TODO(synk): on v7x, verify in xprof that the net axis megacore-shards; if both nets land
        # on one TensorCore, switch that axis to pltpu.CORE_PARALLEL.
        compiler_params=pltpu.CompilerParams(
            dimension_semantics=("parallel", "parallel")),
        cost_estimate=cost,
    )(x, *[fwd[k] for k in _FWD_ORDER])

    return out[..., :na] if na_pad != na else out


@functools.partial(jax.jit, static_argnames=('net', 'n_branches', 'act_dim'))
def _neural_forward_single(x, fwd, *, net, n_branches, act_dim):
    out = _pallas_forward(x, fwd, net=net, n_branches=n_branches, act_dim=act_dim)
    return out.reshape(x.shape[0], n_branches, act_dim)      # free contiguous reshape


@functools.partial(jax.jit, static_argnames=('n_branches', 'act_dim'))
def _neural_forward_both(x, fwd, *, n_branches, act_dim):
    out = _pallas_forward(x, fwd, net=None, n_branches=n_branches, act_dim=act_dim)
    out = out.reshape(2, x.shape[0], n_branches, act_dim)
    return out[0], out[1]                                      # (online, target)


# --------------------------------------------------------------------------- params
def _init_linear(key, fan_in, fan_out):
    # PyTorch nn.Linear default init: U(-1/sqrt(fan_in), 1/sqrt(fan_in)) for W and b.
    kw, kb = jax.random.split(key)
    bound = 1.0 / np.sqrt(fan_in)
    w = jax.random.uniform(kw, (fan_in, fan_out), jnp.float32, -bound, bound)
    b = jax.random.uniform(kb, (1, fan_out), jnp.float32, -bound, bound)
    return w, b


def _combine_matrix(n_branches, act_dim, na_pad):
    """C: (N*A + 1, na_pad) implementing  adv - mean_over_branches(adv) + state  (zero-padded)."""
    na = n_branches * act_dim
    c = np.zeros((na + 1, na_pad), np.float32)
    for j in range(na):
        a = j % act_dim
        c[j, j] += 1.0
        for m in range(n_branches):
            c[m * act_dim + a, j] -= 1.0 / n_branches
        c[na, j] = 1.0                       # state value added to every output column
    return jnp.asarray(c)


def init_neural_params(key, input_dim, outputs_dim):
    """Returns (fused f32 master params for one net, raw unfused f32 params for the reference)."""
    assert len(set(outputs_dim)) == 1, "torch.stack requires equal branch output dims"
    act_dim = outputs_dim[0]
    n_br = len(outputs_dim)
    keys = jax.random.split(key, 4 + 2 * n_br)

    w1, b1 = _init_linear(keys[0], input_dim, 512)
    w2, b2 = _init_linear(keys[1], 512, 256)
    ws1, bs1 = _init_linear(keys[2], 256, 128)
    ws2, bs2 = _init_linear(keys[3], 128, 1)

    wb1_l, bb1_l, wb2_l, bb2_l = [], [], [], []
    for n in range(n_br):
        wa, ba = _init_linear(keys[4 + 2 * n], 256, 128)
        wb, bb = _init_linear(keys[5 + 2 * n], 128, act_dim)
        wb1_l.append(wa); bb1_l.append(ba); wb2_l.append(wb); bb2_l.append(bb)

    # fuse heads layer 1: one wide matmul (branches first, state-value head last)
    wh1 = jnp.concatenate(wb1_l + [ws1], axis=1)                # (256, 128*(N+1))
    bh1 = jnp.concatenate(bb1_l + [bs1], axis=1)

    # fuse heads layer 2: block-diagonal, then fold dueling combine + pad output lanes to 128
    hid = 128 * (n_br + 1)
    na = n_br * act_dim
    na_pad = _round_up(max(na, 128), 128)
    wh2_bd = jnp.zeros((hid, na + 1), jnp.float32)
    for n in range(n_br):
        wh2_bd = wh2_bd.at[n * 128:(n + 1) * 128, n * act_dim:(n + 1) * act_dim].set(wb2_l[n])
    wh2_bd = wh2_bd.at[n_br * 128:, na:].set(ws2)
    bh2_bd = jnp.concatenate(bb2_l + [bs2], axis=1)             # (1, na+1)

    comb = _combine_matrix(n_br, act_dim, na_pad)               # (na+1, na_pad)
    wh2 = jnp.dot(wh2_bd, comb, precision=jax.lax.Precision.HIGHEST)   # (hid, na_pad) f32
    bh2 = jnp.dot(bh2_bd, comb, precision=jax.lax.Precision.HIGHEST)   # (1, na_pad)  f32

    master = dict(w1=w1, b1=b1, w2=w2, b2=b2, wh1=wh1, bh1=bh1, wh2=wh2, bh2=bh2)
    raw = dict(w1=w1, b1=b1, w2=w2, b2=b2, ws1=ws1, bs1=bs1, ws2=ws2, bs2=bs2,
               wb1=jnp.stack(wb1_l), bb1=jnp.stack(bb1_l),
               wb2=jnp.stack(wb2_l), bb2=jnp.stack(bb2_l))
    return master, raw


def _forward_params(master):
    """Stacked f32 master -> forward params: bf16 weights + one packed f32 bias array."""
    bf16 = jnp.bfloat16
    biases = jnp.concatenate(
        [master['b1'], master['b2'], master['bh1'], master['bh2']], axis=-1)   # (2,1,total)
    return dict(w1=master['w1'].astype(bf16), w2=master['w2'].astype(bf16),
                wh1=master['wh1'].astype(bf16), wh2=master['wh2'].astype(bf16),
                biases=biases)


class DoubleNeuralPallas:
    """JAX/Pallas analogue of the PyTorch DoubleNeural module."""

    def __init__(self, input_dim, outputs_dim, key):
        self.n_branches = len(outputs_dim)
        self.act_dim = outputs_dim[0]
        master, raw = init_neural_params(key, input_dim, outputs_dim)
        # leading axis: 0 = online, 1 = target (deepcopy of online at init); f32 master copy
        self.master = jax.tree_util.tree_map(lambda p: jnp.stack([p, p]), master)
        self.params = _forward_params(self.master)        # bf16 forward copy
        self.raw_online = raw                             # for the reference check in __main__
        self.tau = 0.1

    def align_target_network(self):
        tau = self.tau

        def soft_update(p):   # update in f32 master space: no repeated bf16 re-rounding drift
            return p.at[1].set(tau * p[0] + (1.0 - tau) * p[1])

        self.master = jax.tree_util.tree_map(soft_update, self.master)
        self.params = _forward_params(self.master)

    def __call__(self, x, model):
        if model == 'online':
            net = 0
        elif model == 'target':
            net = 1
        else:
            raise ValueError(model)
        return _neural_forward_single(x, self.params, net=net,
                                      n_branches=self.n_branches, act_dim=self.act_dim)

    def forward_both(self, x):
        """Online + target in ONE pallas_call (net grid axis, 'parallel')."""
        return _neural_forward_both(x, self.params,
                                    n_branches=self.n_branches, act_dim=self.act_dim)


# --------------------------------------------------------------------------- reference (pure JAX, unfused f32 weights)
def _reference_forward(x, raw):
    def mm(a, w):
        return jnp.dot(a, w, preferred_element_type=jnp.float32,
                       precision=jax.lax.Precision.HIGHEST)

    h1 = jnp.maximum(mm(x, raw['w1']) + raw['b1'], 0.0)
    shared = mm(h1, raw['w2']) + raw['b2']
    hs = jnp.maximum(mm(shared, raw['ws1']) + raw['bs1'], 0.0)
    state = mm(hs, raw['ws2']) + raw['bs2']                                     # (B, 1)
    hb = jnp.maximum(jnp.einsum('bd,ndh->nbh', shared, raw['wb1'],
                                precision=jax.lax.Precision.HIGHEST) + raw['bb1'], 0.0)
    adv = jnp.einsum('nbh,nha->nba', hb, raw['wb2'],
                     precision=jax.lax.Precision.HIGHEST) + raw['bb2']          # (N, B, A)
    out = adv - jnp.mean(adv, axis=0, keepdims=True) + state[None, :, :]
    return jnp.rot90(out, 1, axes=(0, 1))                                       # (B, N, A)


# --------------------------------------------------------------------------- main
if __name__ == "__main__":
    key = jax.random.PRNGKey(0)
    k_param, k_x = jax.random.split(key)

    input_dim = 32
    outputs_dim = [16, 16, 16]      # 3 branches, 16 actions each
    batch = 8                        # NOTE: matmul cost is flat up to 128/256 MXU rows -> batch more if possible

    model = DoubleNeuralPallas(input_dim, outputs_dim, k_param)
    x = jax.random.normal(k_x, (batch, input_dim), dtype=jnp.float32)

    out_online = jax.block_until_ready(model(x, 'online'))
    out_target = jax.block_until_ready(model(x, 'target'))
    both_online, both_target = model.forward_both(x)
    both_online = jax.block_until_ready(both_online)
    both_target = jax.block_until_ready(both_target)

    assert out_online.shape == (batch, len(outputs_dim), outputs_dim[0])
    assert out_target.shape == out_online.shape
    assert both_online.shape == out_online.shape

    # full-precision reference (original PyTorch semantics); kernel uses bf16 weights/activations
    ref_f32 = _reference_forward(x, model.raw_online)
    np.testing.assert_allclose(np.asarray(out_online), np.asarray(ref_f32),
                               rtol=5e-2, atol=5e-2)
    # target is a deepcopy at init -> identical output
    np.testing.assert_allclose(np.asarray(out_target), np.asarray(out_online),
                               rtol=1e-6, atol=1e-6)
    # fused online+target call matches the individual calls
    np.testing.assert_allclose(np.asarray(both_online), np.asarray(out_online),
                               rtol=1e-6, atol=1e-6)
    np.testing.assert_allclose(np.asarray(both_target), np.asarray(out_target),
                               rtol=1e-6, atol=1e-6)

    # exercise the soft target update (f32 master) + a post-update forward
    model.align_target_network()
    out_target2 = jax.block_until_ready(model(x, 'target'))
    assert out_target2.shape == out_online.shape
    np.testing.assert_allclose(np.asarray(out_target2), np.asarray(out_online),
                               rtol=5e-2, atol=5e-2)

    print("KERNEL_OK")
</pallas_src>

<mosaic_0001>
module attributes {stable_mosaic.version = 11 : i64} {
  func.func @_neural_kernel(%arg0: i32, %arg1: i32, %arg2: memref<8x32xf32, #tpu.memory_space<vmem>>, %arg3: memref<1x32x512xbf16, #tpu.memory_space<vmem>>, %arg4: memref<1x512x256xbf16, #tpu.memory_space<vmem>>, %arg5: memref<1x256x512xbf16, #tpu.memory_space<vmem>>, %arg6: memref<1x512x128xbf16, #tpu.memory_space<vmem>>, %arg7: memref<1x1x1408xf32, #tpu.memory_space<vmem>>, %arg8: memref<1x8x128xf32, #tpu.memory_space<vmem>>) attributes {dimension_semantics = [#tpu.dimension_semantics<parallel>, #tpu.dimension_semantics<parallel>], iteration_bounds = array<i64: 1, 1>, scalar_prefetch = 0 : i64, scratch_operands = 0 : i64, tpu.core_type = #tpu.core_type<tc>, window_params = [{transform_indices = @transform_0, window_bounds = array<i64: 8, 32>}, {transform_indices = @transform_1, window_bounds = array<i64: 1, 32, 512>}, {transform_indices = @transform_2, window_bounds = array<i64: 1, 512, 256>}, {transform_indices = @transform_3, window_bounds = array<i64: 1, 256, 512>}, {transform_indices = @transform_4, window_bounds = array<i64: 1, 512, 128>}, {transform_indices = @transform_5, window_bounds = array<i64: 1, 1, 1408>}, {transform_indices = @transform_6, window_bounds = array<i64: 1, 8, 128>}]} {
    %c0 = arith.constant 0 : index
    %c0_0 = arith.constant 0 : index
    %c0_1 = arith.constant 0 : index
    %0 = vector.load %arg7[%c0, %c0_0, %c0_1] : memref<1x1x1408xf32, #tpu.memory_space<vmem>>, vector<1x1x512xf32>
    %1 = vector.shape_cast %0 : vector<1x1x512xf32> to vector<1x512xf32>
    %c0_2 = arith.constant 0 : index
    %c0_3 = arith.constant 0 : index
    %c512 = arith.constant 512 : index
    %2 = vector.load %arg7[%c0_2, %c0_3, %c512] : memref<1x1x1408xf32, #tpu.memory_space<vmem>>, vector<1x1x256xf32>
    %3 = vector.shape_cast %2 : vector<1x1x256xf32> to vector<1x256xf32>
    %c0_4 = arith.constant 0 : index
    %c0_5 = arith.constant 0 : index
    %c768 = arith.constant 768 : index
    %4 = vector.load %arg7[%c0_4, %c0_5, %c768] : memref<1x1x1408xf32, #tpu.memory_space<vmem>>, vector<1x1x512xf32>
    %5 = vector.shape_cast %4 : vector<1x1x512xf32> to vector<1x512xf32>
    %c0_6 = arith.constant 0 : index
    %c0_7 = arith.constant 0 : index
    %c1280 = arith.constant 1280 : index
    %6 = vector.load %arg7[%c0_6, %c0_7, %c1280] : memref<1x1x1408xf32, #tpu.memory_space<vmem>>, vector<1x1x128xf32>
    %7 = vector.shape_cast %6 : vector<1x1x128xf32> to vector<1x128xf32>
    %c0_8 = arith.constant 0 : index
    %c0_9 = arith.constant 0 : index
    %8 = vector.load %arg2[%c0_8, %c0_9] : memref<8x32xf32, #tpu.memory_space<vmem>>, vector<8x32xf32>
    %9 = arith.truncf %8 : vector<8x32xf32> to vector<8x32xbf16>
    %c0_10 = arith.constant 0 : index
    %c0_11 = arith.constant 0 : index
    %c0_12 = arith.constant 0 : index
    %10 = vector.load %arg3[%c0_10, %c0_11, %c0_12] : memref<1x32x512xbf16, #tpu.memory_space<vmem>>, vector<1x32x512xbf16>
    %11 = vector.shape_cast %10 : vector<1x32x512xbf16> to vector<32x512xbf16>
    %cst = arith.constant dense<0.000000e+00> : vector<8x512xf32>
    %12 = tpu.matmul %9, %11, %cst {dimension_numbers = #tpu.dot_dimension_numbers<[1], [0], [0], [1], [0, 0, 1, 1], [], []>} : vector<8x32xbf16>, vector<32x512xbf16>, vector<8x512xf32> -> vector<8x512xf32>
    %13 = vector.broadcast %1 : vector<1x512xf32> to vector<8x512xf32>
    %14 = arith.addf %12, %13 : vector<8x512xf32>
    %cst_13 = arith.constant 0.000000e+00 : f32
    %15 = vector.broadcast %cst_13 : f32 to vector<8x512xf32>
    %16 = arith.maximumf %14, %15 : vector<8x512xf32>
    %17 = arith.truncf %16 : vector<8x512xf32> to vector<8x512xbf16>
    %c0_14 = arith.constant 0 : index
    %c0_15 = arith.constant 0 : index
    %c0_16 = arith.constant 0 : index
    %18 = vector.load %arg4[%c0_14, %c0_15, %c0_16] : memref<1x512x256xbf16, #tpu.memory_space<vmem>>, vector<1x512x256xbf16>
    %19 = vector.shape_cast %18 : vector<1x512x256xbf16> to vector<512x256xbf16>
    %cst_17 = arith.constant dense<0.000000e+00> : vector<8x256xf32>
    %20 = tpu.matmul %17, %19, %cst_17 {dimension_numbers = #tpu.dot_dimension_numbers<[1], [0], [0], [1], [0, 0, 1, 1], [], []>} : vector<8x512xbf16>, vector<512x256xbf16>, vector<8x256xf32> -> vector<8x256xf32>
    %21 = vector.broadcast %3 : vector<1x256xf32> to vector<8x256xf32>
    %22 = arith.addf %20, %21 : vector<8x256xf32>
    %23 = arith.truncf %22 : vector<8x256xf32> to vector<8x256xbf16>
    %c0_18 = arith.constant 0 : index
    %c0_19 = arith.constant 0 : index
    %c0_20 = arith.constant 0 : index
    %24 = vector.load %arg5[%c0_18, %c0_19, %c0_20] : memref<1x256x512xbf16, #tpu.memory_space<vmem>>, vector<1x256x512xbf16>
    %25 = vector.shape_cast %24 : vector<1x256x512xbf16> to vector<256x512xbf16>
    %cst_21 = arith.constant dense<0.000000e+00> : vector<8x512xf32>
    %26 = tpu.matmul %23, %25, %cst_21 {dimension_numbers = #tpu.dot_dimension_numbers<[1], [0], [0], [1], [0, 0, 1, 1], [], []>} : vector<8x256xbf16>, vector<256x512xbf16>, vector<8x512xf32> -> vector<8x512xf32>
    %27 = vector.broadcast %5 : vector<1x512xf32> to vector<8x512xf32>
    %28 = arith.addf %26, %27 : vector<8x512xf32>
    %cst_22 = arith.constant 0.000000e+00 : f32
    %29 = vector.broadcast %cst_22 : f32 to vector<8x512xf32>
    %30 = arith.maximumf %28, %29 : vector<8x512xf32>
    %31 = arith.truncf %30 : vector<8x512xf32> to vector<8x512xbf16>
    %c0_23 = arith.constant 0 : index
    %c0_24 = arith.constant 0 : index
    %c0_25 = arith.constant 0 : index
    %32 = vector.load %arg6[%c0_23, %c0_24, %c0_25] : memref<1x512x128xbf16, #tpu.memory_space<vmem>>, vector<1x512x128xbf16>
    %33 = vector.shape_cast %32 : vector<1x512x128xbf16> to vector<512x128xbf16>
    %cst_26 = arith.constant dense<0.000000e+00> : vector<8x128xf32>
    %34 = tpu.matmul %31, %33, %cst_26 {dimension_numbers = #tpu.dot_dimension_numbers<[1], [0], [0], [1], [0, 0, 1, 1], [], []>} : vector<8x512xbf16>, vector<512x128xbf16>, vector<8x128xf32> -> vector<8x128xf32>
    %35 = vector.broadcast %7 : vector<1x128xf32> to vector<8x128xf32>
    %36 = arith.addf %34, %35 : vector<8x128xf32>
    %c0_27 = arith.constant 0 : index
    %c0_28 = arith.constant 0 : index
    %c0_29 = arith.constant 0 : index
    %37 = vector.load %arg8[%c0_27, %c0_28, %c0_29] : memref<1x8x128xf32, #tpu.memory_space<vmem>>, vector<1x8x128xf32>
    %38 = vector.shape_cast %37 : vector<1x8x128xf32> to vector<8x128xf32>
    %39 = vector.shape_cast %36 : vector<8x128xf32> to vector<1x8x128xf32>
    tpu.vector_store %arg8[%c0_27, %c0_28, %c0_29], %39 {strides = array<i32>} : memref<1x8x128xf32, #tpu.memory_space<vmem>>, vector<1x8x128xf32>,
    return
  }
  func.func @transform_0(%arg0: i32, %arg1: i32) -> (i32, i32) {
    %c0_i32 = arith.constant 0 : i32
    %c0_i32_0 = arith.constant 0 : i32
    return %arg1, %c0_i32 : i32, i32
  }
  func.func @transform_1(%arg0: i32, %arg1: i32) -> (i32, i32, i32) {
    %c0_i32 = arith.constant 0 : i32
    %c0_i32_0 = arith.constant 0 : i32
    %c0_i32_1 = arith.constant 0 : i32
    %c0_i32_2 = arith.constant 0 : i32
    return %c0_i32, %c0_i32_0, %c0_i32_1 : i32, i32, i32
  }
  func.func @transform_2(%arg0: i32, %arg1: i32) -> (i32, i32, i32) {
    %c0_i32 = arith.constant 0 : i32
    %c0_i32_0 = arith.constant 0 : i32
    %c0_i32_1 = arith.constant 0 : i32
    %c0_i32_2 = arith.constant 0 : i32
    return %c0_i32, %c0_i32_0, %c0_i32_1 : i32, i32, i32
  }
  func.func @transform_3(%arg0: i32, %arg1: i32) -> (i32, i32, i32) {
    %c0_i32 = arith.constant 0 : i32
    %c0_i32_0 = arith.constant 0 : i32
    %c0_i32_1 = arith.constant 0 : i32
    %c0_i32_2 = arith.constant 0 : i32
    return %c0_i32, %c0_i32_0, %c0_i32_1 : i32, i32, i32
  }
  func.func @transform_4(%arg0: i32, %arg1: i32) -> (i32, i32, i32) {
    %c0_i32 = arith.constant 0 : i32
    %c0_i32_0 = arith.constant 0 : i32
    %c0_i32_1 = arith.constant 0 : i32
    %c0_i32_2 = arith.constant 0 : i32
    return %c0_i32, %c0_i32_0, %c0_i32_1 : i32, i32, i32
  }
  func.func @transform_5(%arg0: i32, %arg1: i32) -> (i32, i32, i32) {
    %c0_i32 = arith.constant 0 : i32
    %c0_i32_0 = arith.constant 0 : i32
    %c0_i32_1 = arith.constant 0 : i32
    %c0_i32_2 = arith.constant 0 : i32
    return %c0_i32, %c0_i32_0, %c0_i32_1 : i32, i32, i32
  }
  func.func @transform_6(%arg0: i32, %arg1: i32) -> (i32, i32, i32) {
    %c0_i32 = arith.constant 0 : i32
    %c0_i32_0 = arith.constant 0 : i32
    return %arg0, %arg1, %c0_i32 : i32, i32, i32
  }
}

</mosaic_0001>

<bundles_post_ra>
// kernel: _neural_forward_single.1
= control target key start
LH: loop header
LB: loop body
LE: loop exit
PB: predicated region body
PF: predicated region fallthrough
CT: control target
= control target key end

     0   :  { %11 = vsyncpa [#allocation3], 0  ;;  %s2333_s0 = inlined_call_operand.vmem [shape: f32[8,32], index: 0, kind: input, shape index: {}]   ;;  %s2334_s1 = inlined_call_operand.hbm [shape: bf16[2,32,512], index: 1, kind: input, shape index: {}]   ;;  %s2335_s2 = inlined_call_operand.hbm [shape: bf16[2,512,256], index: 2, kind: input, shape index: {}]   ;;  %s2336_s3 = inlined_call_operand.hbm [shape: bf16[2,256,512], index: 3, kind: input, shape index: {}]   ;;  %s2337_s4 = inlined_call_operand.hbm [shape: bf16[2,512,128], index: 4, kind: input, shape index: {}]   ;;  %s2338_s5 = inlined_call_operand.hbm [shape: f32[2,1,1408], index: 5, kind: input, shape index: {}]   ;;  %s2339_s6 = inlined_call_operand.vmem [shape: f32[1,8,128], index: 6, kind: output, shape index: {}]  }
   0x1   :  { %12 = vsyncpa [#allocation5], 0 }
   0x2   :  { %13 = vsyncpa [#allocation8], 0  ;;  %s2168_s21 = smov [#allocation4]   ;;  %s2052_s25 = scalar_lea.hbm %s2335_s2, 8192 }
   0x3   :  { %s33_s22 = sshll.u32 %s2168_s21, 4  ;;  %p2053_p0 = scmp.ne.s32.totalorder %s2335_s2, %s2052_s25  ;;  %s34_s22 = int_to_ptr.vmem [resolvable:$true] %s33_s22 }
   0x4   :  { %s2054_s30 = scalar_lea.hbm %s2335_s2, 16384  ;;  %p2056_p2 = scmp.lt.u32.totalorder %s2052_s25, %s2335_s2 }
   0x5   :  { %p2055_p1 = scmp.lt.u32.totalorder %s2054_s30, %s2052_s25 }
   0x7   :  { %p2057_p3 = por %p2056_p2, %p2055_p1 }
   0x9   :  { %p2058_p4 = pnand %p2057_p3, %p2053_p0 }
   0xb   :  { %2061 = shalt.err (!%p2058_p4)
}
   0xc   :  { %s2062_s9 = scalar_lea.vmem %s34_s22, 8192  ;;  %p2067_p6 = scmp.lt.s32.totalorder %s34_s22, %s34_s22 }
   0xd   :  { %p2063_p5 = scmp.ne.s32.totalorder %s34_s22, %s2062_s9  ;;  %p2068_p7 = scmp.lt.s32.totalorder %s2062_s9, %s2062_s9 }
   0xf   :  { %p2069_p8 = por %p2068_p7, %p2067_p6 }
  0x11   :  { %p2070_p9 = pnand %p2069_p8, %p2063_p5 }
  0x13   :  { %2073 = shalt.err (!%p2070_p9)
}
  0x14   :  { %s2169_s10 = smov 128   ;;  %s2170_s11 = smov 8  }
  0x15   :  { %39 = dma.hbm_to_vmem [thread:$0]  %s2335_s2, 8192, %s34_s22, [#allocation5], %s2169_s10, %s2169_s10, %s2170_s11  }
  0x16   :  { %s2171_s14 = smov [#allocation7]   ;;  %s2074_s18 = scalar_lea.hbm %s2337_s4, 4096 }
  0x17   :  { %s57_s15 = sshll.u32 %s2171_s14, 4  ;;  %p2075_p10 = scmp.ne.s32.totalorder %s2337_s4, %s2074_s18  ;;  %s58_s15 = int_to_ptr.vmem [resolvable:$true] %s57_s15 }
  0x18   :  { %s2076_s24 = scalar_lea.hbm %s2337_s4, 8192  ;;  %p2078_p12 = scmp.lt.u32.totalorder %s2074_s18, %s2337_s4 }
  0x19   :  { %p2077_p11 = scmp.lt.u32.totalorder %s2076_s24, %s2074_s18 }
  0x1b   :  { %p2079_p13 = por %p2078_p12, %p2077_p11 }
  0x1d   :  { %p2080_p0 = pnand %p2079_p13, %p2075_p10 }
  0x1f   :  { %2083 = shalt.err (!%p2080_p0)
}
  0x20   :  { %s2084_s2 = scalar_lea.vmem %s58_s15, 4096  ;;  %p2089_p2 = scmp.lt.s32.totalorder %s58_s15, %s58_s15 }
  0x21   :  { %p2085_p1 = scmp.ne.s32.totalorder %s58_s15, %s2084_s2  ;;  %p2090_p3 = scmp.lt.s32.totalorder %s2084_s2, %s2084_s2 }
  0x23   :  { %p2091_p4 = por %p2090_p3, %p2089_p2 }
  0x25   :  { %p2092_p5 = pnand %p2091_p4, %p2085_p1 }
  0x27   :  { %2095 = shalt.err (!%p2092_p5)
}
  0x28   :  { %s2172_s22 = smov 64   ;;  %s2173_s27 = smov 4  }
  0x29   :  { %63 = dma.hbm_to_vmem [thread:$0]  %s2337_s4, 4096, %s58_s15, [#allocation8], %s2172_s22, %s2172_s22, %s2173_s27  }
  0x2a   :  { %s2174_s30 = smov [#allocation2]   ;;  %s2096_s10 = scalar_lea.hbm %s2334_s1, 1024 }
  0x2b   :  { %s21_s7 = sshll.u32 %s2174_s30, 4  ;;  %p2097_p6 = scmp.ne.s32.totalorder %s2334_s1, %s2096_s10  ;;  %s22_s7 = int_to_ptr.vmem [resolvable:$true] %s21_s7 }
  0x2c   :  { %s2098_s16 = scalar_lea.hbm %s2334_s1, 2048  ;;  %p2100_p8 = scmp.lt.u32.totalorder %s2096_s10, %s2334_s1 }
  0x2d   :  { %p2099_p7 = scmp.lt.u32.totalorder %s2098_s16, %s2096_s10 }
  0x2f   :  { %p2101_p9 = por %p2100_p8, %p2099_p7 }
  0x31   :  { %p2102_p10 = pnand %p2101_p9, %p2097_p6 }
  0x33   :  { %2105 = shalt.err (!%p2102_p10)
}
  0x34   :  { %s2106_s4 = scalar_lea.vmem %s22_s7, 1024  ;;  %p2111_p12 = scmp.lt.s32.totalorder %s22_s7, %s22_s7 }
  0x35   :  { %p2107_p11 = scmp.ne.s32.totalorder %s22_s7, %s2106_s4  ;;  %p2112_p13 = scmp.lt.s32.totalorder %s2106_s4, %s2106_s4 }
  0x37   :  { %p2113_p0 = por %p2112_p13, %p2111_p12 }
  0x39   :  { %p2114_p1 = pnand %p2113_p0, %p2107_p11 }
  0x3b   :  { %2117 = shalt.err (!%p2114_p1)
}
  0x3c   :  { %s2175_s15 = smov 256   ;;  %s2176_s19 = smov 16  }
  0x3d   :  { %27 = dma.hbm_to_vmem [thread:$0]  %s2334_s1, 1024, %s22_s7, [#allocation3], %s2175_s15, %s2175_s15, %s2176_s19  }
  0x3e   :  { %s2177_s23 = smov [#allocation6]   ;;  %s2178_s25 = smov [#allocation9]  }
  0x3f   :  { %s45_s24 = sshll.u32 %s2177_s23, 4  ;;  %s70_s26 = sshll.u32 %s2178_s25, 4  ;;  %s46_s24 = int_to_ptr.vmem [resolvable:$true] %s45_s24  ;;  %s71_s26 = int_to_ptr.vmem [resolvable:$true] %s70_s26 }
  0x40   :  { %s2118_s27 = scalar_lea.hbm %s2336_s3, 8192  ;;  %s2120_s9 = scalar_lea.hbm %s2336_s3, 16384 }
  0x41   :  { %p2119_p2 = scmp.ne.s32.totalorder %s2336_s3, %s2118_s27  ;;  %p2121_p3 = scmp.lt.u32.totalorder %s2120_s9, %s2118_s27 }
  0x42   :  { %p2122_p4 = scmp.lt.u32.totalorder %s2118_s27, %s2336_s3 }
  0x44   :  { %p2123_p5 = por %p2122_p4, %p2121_p3 }
  0x46   :  { %p2124_p6 = pnand %p2123_p5, %p2119_p2 }
  0x48   :  { %2127 = shalt.err (!%p2124_p6)
}
  0x49   :  { %s2128_s7 = scalar_lea.vmem %s46_s24, 8192  ;;  %p2133_p8 = scmp.lt.s32.totalorder %s46_s24, %s46_s24 }
  0x4a   :  { %p2129_p7 = scmp.ne.s32.totalorder %s46_s24, %s2128_s7  ;;  %p2134_p9 = scmp.lt.s32.totalorder %s2128_s7, %s2128_s7 }
  0x4c   :  { %p2135_p10 = por %p2134_p9, %p2133_p8 }
  0x4e   :  { %p2136_p11 = pnand %p2135_p10, %p2129_p7 }
  0x50   :  { %2139 = shalt.err (!%p2136_p11)
}
  0x51   :  { %51 = dma.hbm_to_vmem [thread:$0]  %s2336_s3, 8192, %s46_s24, [#allocation5], %s2175_s15, %s2175_s15, %s2176_s19  }
  0x52   :  { %s2140_s16 = scalar_lea.hbm %s2338_s5, 176  ;;  %s2142_s21 = scalar_lea.hbm %s2338_s5, 352 }
  0x53   :  { %p2141_p12 = scmp.ne.s32.totalorder %s2338_s5, %s2140_s16  ;;  %p2143_p13 = scmp.lt.u32.totalorder %s2142_s21, %s2140_s16 }
  0x54   :  { %p2144_p0 = scmp.lt.u32.totalorder %s2140_s16, %s2338_s5 }
  0x56   :  { %p2145_p1 = por %p2144_p0, %p2143_p13 }
  0x58   :  { %p2146_p2 = pnand %p2145_p1, %p2141_p12 }
  0x5a   :  { %2149 = shalt.err (!%p2146_p2)
}
  0x5b   :  { %s2150_s3 = scalar_lea.vmem %s71_s26, 176  ;;  %s2154_s15 = scalar_lea.vmem %s71_s26, 192 }
  0x5c   :  { %p2151_p3 = scmp.ne.s32.totalorder %s71_s26, %s2150_s3  ;;  %p2155_p4 = scmp.lt.s32.totalorder %s71_s26, %s71_s26 }
  0x5d   :  { %p2156_p5 = scmp.lt.s32.totalorder %s2154_s15, %s2150_s3 }
  0x5f   :  { %p2157_p6 = por %p2156_p5, %p2155_p4 }
  0x61   :  { %p2158_p7 = pnand %p2157_p6, %p2151_p3 }
  0x63   :  { %2161 = shalt.err (!%p2158_p7)
}
  0x64   :  { %73 = dma.hbm_to_vmem [thread:$0]  %s2338_s5, 176, %s71_s26, [#allocation8]  }
  0x65   :  { %2162 = dma.done.wait [#allocation3], 1024  }
  0x66   :  { %2163 = vsyncadd [#allocation3], 4294966272 }
  0x67   :  { %2164 = dma.done.wait [#allocation5], 16384  }
  0x68   :  { %2165 = vsyncadd [#allocation5], 4294950912 }
  0x69   :  { %2166 = dma.done.wait [#allocation8], 4272  }
  0x6a   :  { %2167 = vsyncadd [#allocation8], 4294963024  ;;  %v2179_v0 = vmov 0   ;;  %v1816_v1 = vld [vmem:[#allocation2 + $0x4] ss:$16 sps:$4 sm:$0xff]   ;;  %vm165_vm0 = vcmask 261120  }
  0x6b   :  { %201 = vmatprep.mubr.bf16.mxu0 %v2179_v0  ;;  %242 = vmatprep.mubr.bf16.mxu1 %v2179_v0  ;;  %v1818_v2 = vld [vmem:[#allocation2] ss:$16 sps:$4 sm:$0xff]   ;;  %v1819_v3 = vld [vmem:[#allocation2 + $0x24] ss:$16 sps:$4 sm:$0xff]   ;;  %v1822_v6 = vld [vmem:[#allocation2 + $0xc] ss:$16 sps:$4 sm:$0xff]  }
  0x6c   :  { %169 = vmatprep.subr.bf16.mxu0 %v1816_v1  ;;  %v1821_v4 = vld [vmem:[#allocation2 + $0x20] ss:$16 sps:$4 sm:$0xff]   ;;  %v1824_v7 = vld [vmem:[#allocation2 + $0x8] ss:$16 sps:$4 sm:$0xff]   ;;  %210 = vmatprep.subr.bf16.mxu1 %v1822_v6  ;;  %v1825_v8 = vld [vmem:[#allocation2 + $0x2c] ss:$16 sps:$4 sm:$0xff]  }
  0x6d   :  { %v94_v5 = vld [vmem:[%s2333_s0] sm:$0xff]  ;;  %170 = vmatpush1.bf16.msra.mxu0 %v1818_v2  ;;  %211 = vmatpush1.bf16.msra.mxu1 %v1824_v7  ;;  %v1827_v10 = vld [vmem:[#allocation2 + $0x28] ss:$16 sps:$4 sm:$0xff]   ;;  %v1833_v13 = vld [vmem:[#allocation4 + $0x14] ss:$8 sps:$4 sm:$0xff]   ;;  %v105_v2 = vlaneseq }
  0x6e   :  { %171 = vmatprep.subr.bf16.mxu0 %v1819_v3  ;;  %v95_v9 = vpack.c.bf16 %v94_v5, %v94_v5  ;;  %v1830_v11 = vld [vmem:[#allocation4 + $0x4] ss:$8 sps:$4 sm:$0xff]   ;;  %212 = vmatprep.subr.bf16.mxu1 %v1825_v8  ;;  %v1828_v12 = vld [vmem:[#allocation4] ss:$8 sps:$4 sm:$0xff]   ;;  %v1831_v14 = vld [vmem:[#allocation4 + $0x10] ss:$8 sps:$4 sm:$0xff]  }
  0x6f   :  { %v1836_v15 = vld [vmem:[#allocation4 + $0x24] ss:$8 sps:$4 sm:$0xff]   ;;  %v1834_v16 = vld [vmem:[#allocation4 + $0x20] ss:$8 sps:$4 sm:$0xff]   ;;  %v1839_v17 = vld [vmem:[#allocation4 + $0x34] ss:$8 sps:$4 sm:$0xff]  }
  0x70   :  { %v1837_v18 = vld [vmem:[#allocation4 + $0x30] ss:$8 sps:$4 sm:$0xff]   ;;  %v1842_v19 = vld [vmem:[#allocation4 + $0x44] ss:$8 sps:$4 sm:$0xff]   ;;  %v1840_v20 = vld [vmem:[#allocation4 + $0x40] ss:$8 sps:$4 sm:$0xff]  }
  0x71   :  { %172 = vmatpush1.bf16.msra.mxu0 %v1821_v4  ;;  %213 = vmatpush1.bf16.msra.mxu1 %v1827_v10  ;;  %v1845_v21 = vld [vmem:[#allocation4 + $0x54] ss:$8 sps:$4 sm:$0xff]   ;;  %v1843_v22 = vld [vmem:[#allocation4 + $0x50] ss:$8 sps:$4 sm:$0xff]   ;;  %v1848_v23 = vld [vmem:[#allocation4 + $0x64] ss:$8 sps:$4 sm:$0xff]  }
  0x72   :  { %654 = vmatprep.subr.bf16.mxu0 %v1830_v11  ;;  %v1846_v24 = vld [vmem:[#allocation4 + $0x60] ss:$8 sps:$4 sm:$0xff]   ;;  %v1851_v25 = vld [vmem:[#allocation4 + $0x74] ss:$8 sps:$4 sm:$0xff]   ;;  %v1849_v26 = vld [vmem:[#allocation4 + $0x70] ss:$8 sps:$4 sm:$0xff]  }
  0x73   :  { %v1854_v27 = vld [vmem:[#allocation4 + $0x84] ss:$8 sps:$4 sm:$0xff]   ;;  %v1852_v28 = vld [vmem:[#allocation4 + $0x80] ss:$8 sps:$4 sm:$0xff]   ;;  %v1857_v29 = vld [vmem:[#allocation4 + $0x94] ss:$8 sps:$4 sm:$0xff]  }
  0x74   :  { %1591 = vmatmul.mubr.msk.bf16.vlgmr.msra.gmra.mrb[0].mxu0 %vm165_vm0, %v95_v9  ;;  %1592 = vmatmul.mubr.msk.bf16.vlgmr.msra.gmra.mrb[0].mxu1 %vm165_vm0, %v95_v9  ;;  %v1855_v30 = vld [vmem:[#allocation4 + $0x90] ss:$8 sps:$4 sm:$0xff]   ;;  %v1860_v31 = vld [vmem:[#allocation4 + $0xa4] ss:$8 sps:$4 sm:$0xff]   ;;  %v1858_v32 = vld [vmem:[#allocation4 + $0xa0] ss:$8 sps:$4 sm:$0xff]  }
  0x75   :  { %655 = vmatpush1.bf16.msra.mxu0 %v1828_v12  ;;  %v1863_v33 = vld [vmem:[#allocation4 + $0xb4] ss:$8 sps:$4 sm:$0xff]   ;;  %v1861_v34 = vld [vmem:[#allocation4 + $0xb0] ss:$8 sps:$4 sm:$0xff]   ;;  %v1866_v35 = vld [vmem:[#allocation4 + $0xc4] ss:$8 sps:$4 sm:$0xff]  }
  0x76   :  { %656 = vmatprep.subr.bf16.mxu0 %v1833_v13  ;;  %v1864_v36 = vld [vmem:[#allocation4 + $0xc0] ss:$8 sps:$4 sm:$0xff]   ;;  %v1869_v37 = vld [vmem:[#allocation4 + $0xd4] ss:$8 sps:$4 sm:$0xff]   ;;  %v1867_v38 = vld [vmem:[#allocation4 + $0xd0] ss:$8 sps:$4 sm:$0xff]  }
  0x77   :  { %v1872_v39 = vld [vmem:[#allocation4 + $0xe4] ss:$8 sps:$4 sm:$0xff]   ;;  %v1870_v40 = vld [vmem:[#allocation4 + $0xe0] ss:$8 sps:$4 sm:$0xff]   ;;  %v1875_v41 = vld [vmem:[#allocation4 + $0xf4] ss:$8 sps:$4 sm:$0xff]  }
  0x78   :  { %v1873_v42 = vld [vmem:[#allocation4 + $0xf0] ss:$8 sps:$4 sm:$0xff]   ;;  %v1878_v43 = vld [vmem:[#allocation4 + $0x104] ss:$8 sps:$4 sm:$0xff]   ;;  %v2293_v5 = vshrl.u32 %v105_v2, 7 }
  0x79   :  { %657 = vmatpush1.bf16.msra.mxu0 %v1831_v14  ;;  %v1924_v44 = vld [vmem:[#allocation6] ss:$16 sps:$4 sm:$0xff]   ;;  %v1926_v45 = vld [vmem:[#allocation6 + $0x4] ss:$16 sps:$4 sm:$0xff]  }
  0x7a   :  { %658 = vmatprep.subr.bf16.mxu0 %v1836_v15  ;;  %v1929_v46 = vld [vmem:[#allocation6 + $0x24] ss:$16 sps:$4 sm:$0xff]   ;;  %1143 = vmatprep.subr.bf16.mxu1 %v1926_v45  ;;  %v1927_v47 = vld [vmem:[#allocation6 + $0x20] ss:$16 sps:$4 sm:$0xff]   ;;  %v2296_v8 = vsub.s32 0, %v2293_v5  ;;  %v2301_v11 = vsub.s32 1, %v2293_v5 }
  0x7b   :  { %1144 = vmatpush1.bf16.msra.mxu1 %v1924_v44  ;;  %v1932_v48 = vld [vmem:[#allocation6 + $0x44] ss:$16 sps:$4 sm:$0xff]   ;;  %v1930_v49 = vld [vmem:[#allocation6 + $0x40] ss:$16 sps:$4 sm:$0xff]   ;;  %v119_v14 = vsub.s32 3, %v2293_v5 }
  0x7c   :  { %1145 = vmatprep.subr.bf16.mxu1 %v1929_v46  ;;  %v1935_v50 = vld [vmem:[#allocation6 + $0x64] ss:$16 sps:$4 sm:$0xff]   ;;  %v1933_v51 = vld [vmem:[#allocation6 + $0x60] ss:$16 sps:$4 sm:$0xff]  }
  0x7d   :  { %659 = vmatpush1.bf16.msra.mxu0 %v1834_v16  ;;  %v1938_v52 = vld [vmem:[#allocation6 + $0x84] ss:$16 sps:$4 sm:$0xff]   ;;  %v1936_v53 = vld [vmem:[#allocation6 + $0x80] ss:$16 sps:$4 sm:$0xff]  }
  0x7e   :  { %660 = vmatprep.subr.bf16.mxu0 %v1839_v17  ;;  %v1941_v54 = vld [vmem:[#allocation6 + $0xa4] ss:$16 sps:$4 sm:$0xff]   ;;  %v1939_v55 = vld [vmem:[#allocation6 + $0xa0] ss:$16 sps:$4 sm:$0xff]  }
  0x7f   :  { %1146 = vmatpush1.bf16.msra.mxu1 %v1927_v47  ;;  %v1944_v56 = vld [vmem:[#allocation6 + $0xc4] ss:$16 sps:$4 sm:$0xff]   ;;  %v1942_v57 = vld [vmem:[#allocation6 + $0xc0] ss:$16 sps:$4 sm:$0xff]  }
  0x80   :  { %1147 = vmatprep.subr.bf16.mxu1 %v1932_v48  ;;  %v1947_v58 = vld [vmem:[#allocation6 + $0xe4] ss:$16 sps:$4 sm:$0xff]   ;;  %v1945_v59 = vld [vmem:[#allocation6 + $0xe0] ss:$16 sps:$4 sm:$0xff]  }
  0x81   :  { %661 = vmatpush1.bf16.msra.mxu0 %v1837_v18  ;;  %v1950_v60 = vld [vmem:[#allocation6 + $0x104] ss:$16 sps:$4 sm:$0xff]   ;;  %v1948_v61 = vld [vmem:[#allocation6 + $0x100] ss:$16 sps:$4 sm:$0xff]  }
  0x82   :  { %662 = vmatprep.subr.bf16.mxu0 %v1842_v19  ;;  %v1953_v62 = vld [vmem:[#allocation6 + $0x124] ss:$16 sps:$4 sm:$0xff]   ;;  %v1951_v63 = vld [vmem:[#allocation6 + $0x120] ss:$16 sps:$4 sm:$0xff]  }
  0x83   :  { %1148 = vmatpush1.bf16.msra.mxu1 %v1930_v49  ;;  %v1956_v0 = vld [vmem:[#allocation6 + $0x144] ss:$16 sps:$4 sm:$0xff]   ;;  %v1954_v1 = vld [vmem:[#allocation6 + $0x140] ss:$16 sps:$4 sm:$0xff]  }
  0x84   :  { %1149 = vmatprep.subr.bf16.mxu1 %v1935_v50  ;;  %v1959_v3 = vld [vmem:[#allocation6 + $0x164] ss:$16 sps:$4 sm:$0xff]   ;;  %v1957_v4 = vld [vmem:[#allocation6 + $0x160] ss:$16 sps:$4 sm:$0xff]  }
  0x85   :  { %663 = vmatpush1.bf16.msra.mxu0 %v1840_v20  ;;  %v1962_v6 = vld [vmem:[#allocation6 + $0x184] ss:$16 sps:$4 sm:$0xff]   ;;  %v1960_v7 = vld [vmem:[#allocation6 + $0x180] ss:$16 sps:$4 sm:$0xff]  }
  0x86   :  { %664 = vmatprep.subr.bf16.mxu0 %v1845_v21  ;;  %v1965_v9 = vld [vmem:[#allocation6 + $0x1a4] ss:$16 sps:$4 sm:$0xff]   ;;  %v2298_v10 = vld [vmem:[#allocation9] sm:$0xf]  ;;  %v1891_v46 = vld [vmem:[#allocation4 + $0x150] ss:$8 sps:$4 sm:$0xff]  }
  0x87   :  { %1150 = vmatpush1.bf16.msra.mxu1 %v1933_v51  ;;  %v1963_v12 = vld [vmem:[#allocation6 + $0x1a0] ss:$16 sps:$4 sm:$0xff]   ;;  %v108_v13 = vrot.slane %v2298_v10, %v2296_v8  ;;  %v1968_v15 = vld [vmem:[#allocation6 + $0x1c4] ss:$16 sps:$4 sm:$0xff]   ;;  %v112_v16 = vrot.slane %v2298_v10, %v2301_v11  ;;  %v120_v21 = vrot.slane %v2298_v10, %v119_v14 }
  0x88   :  { %1151 = vmatprep.subr.bf16.mxu1 %v1938_v52  ;;  %v1966_v18 = vld [vmem:[#allocation6 + $0x1c0] ss:$16 sps:$4 sm:$0xff]   ;;  %v1893_v45 = vld [vmem:[#allocation4 + $0x154] ss:$8 sps:$4 sm:$0xff]   ;;  %v1896_v47 = vld [vmem:[#allocation4 + $0x164] ss:$8 sps:$4 sm:$0xff]  }
  0x89   :  { %665 = vmatpush1.bf16.msra.mxu0 %v1843_v22  ;;  %v1888_v44 = vld [vmem:[#allocation4 + $0x140] ss:$8 sps:$4 sm:$0xff]   ;;  %v1899_v49 = vld [vmem:[#allocation4 + $0x174] ss:$8 sps:$4 sm:$0xff]   ;;  %v1897_v50 = vld [vmem:[#allocation4 + $0x170] ss:$8 sps:$4 sm:$0xff]  }
  0x8a   :  { %666 = vmatprep.subr.bf16.mxu0 %v1848_v23  ;;  %v1894_v48 = vld [vmem:[#allocation4 + $0x160] ss:$8 sps:$4 sm:$0xff]   ;;  %v1902_v51 = vld [vmem:[#allocation4 + $0x184] ss:$8 sps:$4 sm:$0xff]  }
  0x8b   :  { %1152 = vmatpush1.bf16.msra.mxu1 %v1936_v53  ;;  %v1900_v52 = vld [vmem:[#allocation4 + $0x180] ss:$8 sps:$4 sm:$0xff]   ;;  %v1905_v53 = vld [vmem:[#allocation4 + $0x194] ss:$8 sps:$4 sm:$0xff]  }
  0x8c   :  { %1153 = vmatprep.subr.bf16.mxu1 %v1941_v54  ;;  %v1903_v54 = vld [vmem:[#allocation4 + $0x190] ss:$8 sps:$4 sm:$0xff]   ;;  %v1918_v2 = vld [vmem:[#allocation4 + $0x1e0] ss:$8 sps:$4 sm:$0xff]  }
  0x8d   :  { %667 = vmatpush1.bf16.msra.mxu0 %v1846_v24 }
  0x8e   :  { %668 = vmatprep.subr.bf16.mxu0 %v1851_v25 }
  0x8f   :  { %1154 = vmatpush1.bf16.msra.mxu1 %v1939_v55  ;;  %v1908_v55 = vld [vmem:[#allocation4 + $0x1a4] ss:$8 sps:$4 sm:$0xff]  }
  0x90   :  { %1155 = vmatprep.subr.bf16.mxu1 %v1944_v56  ;;  %v1906_v56 = vld [vmem:[#allocation4 + $0x1a0] ss:$8 sps:$4 sm:$0xff]  }
  0x91   :  { %669 = vmatpush1.bf16.msra.mxu0 %v1849_v26 }
  0x92   :  { %670 = vmatprep.subr.bf16.mxu0 %v1854_v27 }
  0x93   :  { %1156 = vmatpush1.bf16.msra.mxu1 %v1942_v57  ;;  %v1911_v57 = vld [vmem:[#allocation4 + $0x1b4] ss:$8 sps:$4 sm:$0xff]  }
  0x94   :  { %1157 = vmatprep.subr.bf16.mxu1 %v1947_v58  ;;  %v1909_v58 = vld [vmem:[#allocation4 + $0x1b0] ss:$8 sps:$4 sm:$0xff]  }
  0x95   :  { %671 = vmatpush1.bf16.msra.mxu0 %v1852_v28 }
  0x96   :  { %672 = vmatprep.subr.bf16.mxu0 %v1857_v29 }
  0x97   :  { %1158 = vmatpush1.bf16.msra.mxu1 %v1945_v59  ;;  %v1914_v59 = vld [vmem:[#allocation4 + $0x1c4] ss:$8 sps:$4 sm:$0xff]  }
  0x98   :  { %1159 = vmatprep.subr.bf16.mxu1 %v1950_v60  ;;  %v1912_v60 = vld [vmem:[#allocation4 + $0x1c0] ss:$8 sps:$4 sm:$0xff]  }
  0x99   :  { %673 = vmatpush1.bf16.msra.mxu0 %v1855_v30 }
  0x9a   :  { %674 = vmatprep.subr.bf16.mxu0 %v1860_v31 }
  0x9b   :  { %1160 = vmatpush1.bf16.msra.mxu1 %v1948_v61  ;;  %v115_v61 = vsub.s32 2, %v2293_v5 }
  0x9c   :  { %1161 = vmatprep.subr.bf16.mxu1 %v1953_v62  ;;  %v1917_v62 = vld [vmem:[#allocation4 + $0x1d4] ss:$8 sps:$4 sm:$0xff]  }
  0x9d   :  { %675 = vmatpush1.bf16.msra.mxu0 %v1858_v32  ;;  %v1876_v32 = vld [vmem:[#allocation4 + $0x100] ss:$8 sps:$4 sm:$0xff]  }
  0x9e   :  { %676 = vmatprep.subr.bf16.mxu0 %v1863_v33 }
  0x9f   :  { %1162 = vmatpush1.bf16.msra.mxu1 %v1951_v63  ;;  %v1915_v63 = vld [vmem:[#allocation4 + $0x1d0] ss:$8 sps:$4 sm:$0xff]  }
  0xa0   :  { %1163 = vmatprep.subr.bf16.mxu1 %v1956_v0  ;;  %v116_v0 = vrot.slane %v2298_v10, %v115_v61  ;;  %v1974_v10 = vld [vmem:[#allocation6 + $0xc] ss:$16 sps:$4 sm:$0xff]  }
  0xa1   :  { %677 = vmatpush1.bf16.msra.mxu0 %v1861_v34 }
  0xa2   :  { %678 = vmatprep.subr.bf16.mxu0 %v1866_v35  ;;  %v1881_v35 = vld [vmem:[#allocation4 + $0x114] ss:$8 sps:$4 sm:$0xff]  }
  0xa3   :  { %1164 = vmatpush1.bf16.msra.mxu1 %v1954_v1  ;;  %v1920_v1 = vld [vmem:[#allocation4 + $0x1e4] ss:$8 sps:$4 sm:$0xff]  }
  0xa4   :  { %1165 = vmatprep.subr.bf16.mxu1 %v1959_v3 }
  0xa5   :  { %679 = vmatpush1.bf16.msra.mxu0 %v1864_v36 }
  0xa6   :  { %680 = vmatprep.subr.bf16.mxu0 %v1869_v37 }
  0xa7   :  { %1166 = vmatpush1.bf16.msra.mxu1 %v1957_v4  ;;  %v1923_v4 = vld [vmem:[#allocation4 + $0x1f4] ss:$8 sps:$4 sm:$0xff]  }
  0xa8   :  { %1167 = vmatprep.subr.bf16.mxu1 %v1962_v6  ;;  %v1921_v6 = vld [vmem:[#allocation4 + $0x1f0] ss:$8 sps:$4 sm:$0xff]  }
  0xa9   :  { %681 = vmatpush1.bf16.msra.mxu0 %v1867_v38  ;;  %v1879_v38 = vld [vmem:[#allocation4 + $0x110] ss:$8 sps:$4 sm:$0xff]  }
  0xaa   :  { %682 = vmatprep.subr.bf16.mxu0 %v1872_v39  ;;  %v1884_v39 = vld [vmem:[#allocation4 + $0x124] ss:$8 sps:$4 sm:$0xff]  }
  0xab   :  { %1168 = vmatpush1.bf16.msra.mxu1 %v1960_v7 }
  0xac   :  { %1169 = vmatprep.subr.bf16.mxu1 %v1965_v9 }
  0xad   :  { %683 = vmatpush1.bf16.msra.mxu0 %v1870_v40  ;;  %v1882_v40 = vld [vmem:[#allocation4 + $0x120] ss:$8 sps:$4 sm:$0xff]  }
  0xae   :  { %684 = vmatprep.subr.bf16.mxu0 %v1875_v41  ;;  %v1887_v41 = vld [vmem:[#allocation4 + $0x134] ss:$8 sps:$4 sm:$0xff]  }
  0xaf   :  { %1170 = vmatpush1.bf16.msra.mxu1 %v1963_v12  ;;  %v1971_v12 = vld [vmem:[#allocation6 + $0x1e4] ss:$16 sps:$4 sm:$0xff]  }
  0xb0   :  { %1171 = vmatprep.subr.bf16.mxu1 %v1968_v15  ;;  %v2020_v15 = vld [vmem:[#allocation7 + $0x40] sm:$0xff]  }
  0xb1   :  { %685 = vmatpush1.bf16.msra.mxu0 %v1873_v42  ;;  %v1885_v42 = vld [vmem:[#allocation4 + $0x130] ss:$8 sps:$4 sm:$0xff]  }
  0xb2   :  { %695 = vmatprep.subr.bf16.mxu0 %v1878_v43  ;;  %v1890_v43 = vld [vmem:[#allocation4 + $0x144] ss:$8 sps:$4 sm:$0xff]  }
  0xb3   :  { %1172 = vmatpush1.bf16.msra.mxu1 %v1966_v18  ;;  %v2023_v18 = vld [vmem:[#allocation7 + $0x8] sm:$0xff]  }
  0xb4   :  { %1173 = vmatprep.subr.bf16.mxu1 %v1971_v12  ;;  %v2034_v12 = vld [vmem:[#allocation7 + $0x78] sm:$0xff]  }
 0x147   :  { %v203_v17 = vpop.f32.mrb[0].mxu0  ;;  %v2311_v26 = vpop.f32.mrb[0].mxu1 }
 0x148   :  { %v204_v19 = vadd.f32 %v203_v17, %v108_v13  ;;  %v205_v20 = vpop.f32.mrb[1].mxu0  ;;  %v246_v28 = vpop.f32.mrb[1].mxu1  ;;  %v245_v3 = vadd.f32 %v2311_v26, %v116_v0  ;;  %v1969_v13 = vld [vmem:[#allocation6 + $0x1e0] ss:$16 sps:$4 sm:$0xff]   ;;  %v2022_v17 = vld [vmem:[#allocation7 + $0x48] sm:$0xff]  }
 0x149   :  { %v206_v22 = vadd.f32 %v205_v20, %v112_v16  ;;  %v207_v23 = vpop.f32.mrb[2].mxu0  ;;  %v247_v29 = vadd.f32 %v246_v28, %v120_v21  ;;  %v248_v30 = vpop.f32.mrb[2].mxu1  ;;  %1174 = vmatpush1.bf16.msra.mxu1 %v1969_v13  ;;  %v2021_v16 = vld [vmem:[#allocation7] sm:$0xff]   ;;  %v2025_v20 = vld [vmem:[#allocation7 + $0x10] sm:$0xff]   ;;  %v2026_v21 = vld [vmem:[#allocation7 + $0x58] sm:$0xff]  }
 0x14a   :  { %v251_v24 = vmax.f32 %v204_v19, 0.0  ;;  %v208_v25 = vpop.f32.mrb[3].mxu0  ;;  %v249_v33 = vpop.f32.mrb[3].mxu1  ;;  %v253_v7 = vmax.f32 %v245_v3, 0.0  ;;  %1184 = vmatprep.subr.bf16.mxu1 %v1974_v10  ;;  %v2024_v19 = vld [vmem:[#allocation7 + $0x50] sm:$0xff]   ;;  %v2028_v23 = vld [vmem:[#allocation7 + $0x60] sm:$0xff]  }
 0x14b   :  { %v252_v27 = vmax.f32 %v206_v22, 0.0  ;;  %v254_v36 = vmax.f32 %v247_v29, 0.0  ;;  %v2027_v22 = vld [vmem:[#allocation7 + $0x18] sm:$0xff]   ;;  %v2030_v25 = vld [vmem:[#allocation7 + $0x68] sm:$0xff]   ;;  %v2036_v10 = vld [vmem:[#allocation7 + $0xc0] sm:$0xff]  }
 0x14c   :  { %v255_v34 = vpack.c.bf16 %v251_v24, %v251_v24  ;;  %v257_v9 = vpack.c.bf16 %v253_v7, %v253_v7  ;;  %v2029_v24 = vld [vmem:[#allocation7 + $0x20] sm:$0xff]   ;;  %v2031_v26 = vld [vmem:[#allocation7 + $0x28] sm:$0xff]   ;;  %v2032_v7 = vld [vmem:[#allocation7 + $0x70] sm:$0xff]  }
 0x14d   :  { %v256_v31 = vpack.c.bf16 %v252_v27, %v252_v27  ;;  %v258_v37 = vpack.c.bf16 %v254_v36, %v254_v36  ;;  %v91_v27 = vld [vmem:[#allocation9 + $0x4] sm:$0x3]  ;;  %v2013_v0 = vld [vmem:[#allocation6 + $0x1ac] ss:$16 sps:$4 sm:$0xff]   ;;  %v2014_v3 = vld [vmem:[#allocation6 + $0x1c8] ss:$16 sps:$4 sm:$0xff]  }
 0x14e   :  { %v327_v28 = vrot.slane %v91_v27, %v2296_v8  ;;  %v331_v29 = vrot.slane %v91_v27, %v2301_v11  ;;  %v2035_v13 = vld [vmem:[#allocation7 + $0x38] sm:$0xff]   ;;  %v2049_v27 = vld [vmem:[#allocation7 + $0xb0] sm:$0xff]  }
 0x14f   :  { %686 = vmatprep.mubr.bf16.mxu0 %v256_v31 }
 0x150   :  { %687 = vmatmul.mubr.bf16.vlgmr.msra.gmra.mrb[4].mxu0 %v255_v34 }
 0x151   :  { %696 = vmatpush1.bf16.msra.mxu0 %v1876_v32  ;;  %727 = vmatprep.mubr.bf16.mxu0 %v258_v37  ;;  %v1972_v37 = vld [vmem:[#allocation6 + $0x8] ss:$16 sps:$4 sm:$0xff]  }
 0x152   :  { %697 = vmatprep.subr.bf16.mxu0 %v1881_v35 }
 0x155   :  { %698 = vmatpush1.bf16.msra.mxu0 %v1879_v38 }
 0x156   :  { %699 = vmatprep.subr.bf16.mxu0 %v1884_v39  ;;  %v1977_v39 = vld [vmem:[#allocation6 + $0x2c] ss:$16 sps:$4 sm:$0xff]  }
 0x159   :  { %700 = vmatpush1.bf16.msra.mxu0 %v1882_v40  ;;  %v1975_v40 = vld [vmem:[#allocation6 + $0x28] ss:$16 sps:$4 sm:$0xff]  }
 0x15a   :  { %701 = vmatprep.subr.bf16.mxu0 %v1887_v41  ;;  %v1980_v41 = vld [vmem:[#allocation6 + $0x4c] ss:$16 sps:$4 sm:$0xff]  }
 0x15d   :  { %702 = vmatpush1.bf16.msra.mxu0 %v1885_v42  ;;  %v1978_v42 = vld [vmem:[#allocation6 + $0x48] ss:$16 sps:$4 sm:$0xff]  }
 0x15e   :  { %703 = vmatprep.subr.bf16.mxu0 %v1890_v43  ;;  %v1983_v43 = vld [vmem:[#allocation6 + $0x6c] ss:$16 sps:$4 sm:$0xff]  }
 0x161   :  { %704 = vmatpush1.bf16.msra.mxu0 %v1888_v44  ;;  %v1981_v44 = vld [vmem:[#allocation6 + $0x68] ss:$16 sps:$4 sm:$0xff]  }
 0x162   :  { %705 = vmatprep.subr.bf16.mxu0 %v1893_v45  ;;  %v1986_v45 = vld [vmem:[#allocation6 + $0x8c] ss:$16 sps:$4 sm:$0xff]  }
 0x165   :  { %706 = vmatpush1.bf16.msra.mxu0 %v1891_v46  ;;  %v1984_v46 = vld [vmem:[#allocation6 + $0x88] ss:$16 sps:$4 sm:$0xff]  }
 0x166   :  { %707 = vmatprep.subr.bf16.mxu0 %v1896_v47  ;;  %v1989_v47 = vld [vmem:[#allocation6 + $0xac] ss:$16 sps:$4 sm:$0xff]  }
 0x169   :  { %708 = vmatpush1.bf16.msra.mxu0 %v1894_v48  ;;  %v1987_v48 = vld [vmem:[#allocation6 + $0xa8] ss:$16 sps:$4 sm:$0xff]  }
 0x16a   :  { %709 = vmatprep.subr.bf16.mxu0 %v1899_v49  ;;  %v1992_v49 = vld [vmem:[#allocation6 + $0xcc] ss:$16 sps:$4 sm:$0xff]  }
 0x16d   :  { %710 = vmatpush1.bf16.msra.mxu0 %v1897_v50  ;;  %v1990_v50 = vld [vmem:[#allocation6 + $0xc8] ss:$16 sps:$4 sm:$0xff]  }
 0x16e   :  { %711 = vmatprep.subr.bf16.mxu0 %v1902_v51  ;;  %v1995_v51 = vld [vmem:[#allocation6 + $0xec] ss:$16 sps:$4 sm:$0xff]  }
 0x171   :  { %712 = vmatpush1.bf16.msra.mxu0 %v1900_v52  ;;  %v1993_v52 = vld [vmem:[#allocation6 + $0xe8] ss:$16 sps:$4 sm:$0xff]  }
 0x172   :  { %713 = vmatprep.subr.bf16.mxu0 %v1905_v53  ;;  %v1998_v53 = vld [vmem:[#allocation6 + $0x10c] ss:$16 sps:$4 sm:$0xff]  }
 0x175   :  { %714 = vmatpush1.bf16.msra.mxu0 %v1903_v54  ;;  %v1996_v54 = vld [vmem:[#allocation6 + $0x108] ss:$16 sps:$4 sm:$0xff]  }
 0x176   :  { %715 = vmatprep.subr.bf16.mxu0 %v1908_v55  ;;  %v2001_v55 = vld [vmem:[#allocation6 + $0x12c] ss:$16 sps:$4 sm:$0xff]  }
 0x179   :  { %716 = vmatpush1.bf16.msra.mxu0 %v1906_v56  ;;  %v1999_v56 = vld [vmem:[#allocation6 + $0x128] ss:$16 sps:$4 sm:$0xff]  }
 0x17a   :  { %717 = vmatprep.subr.bf16.mxu0 %v1911_v57  ;;  %v2004_v57 = vld [vmem:[#allocation6 + $0x14c] ss:$16 sps:$4 sm:$0xff]  }
 0x17d   :  { %718 = vmatpush1.bf16.msra.mxu0 %v1909_v58  ;;  %v2002_v58 = vld [vmem:[#allocation6 + $0x148] ss:$16 sps:$4 sm:$0xff]  }
 0x17e   :  { %719 = vmatprep.subr.bf16.mxu0 %v1914_v59  ;;  %v2007_v59 = vld [vmem:[#allocation6 + $0x16c] ss:$16 sps:$4 sm:$0xff]  }
 0x181   :  { %720 = vmatpush1.bf16.msra.mxu0 %v1912_v60  ;;  %v2005_v60 = vld [vmem:[#allocation6 + $0x168] ss:$16 sps:$4 sm:$0xff]  }
 0x182   :  { %721 = vmatprep.subr.bf16.mxu0 %v1917_v62  ;;  %v2010_v62 = vld [vmem:[#allocation6 + $0x18c] ss:$16 sps:$4 sm:$0xff]  }
 0x185   :  { %722 = vmatpush1.bf16.msra.mxu0 %v1915_v63  ;;  %v2008_v63 = vld [vmem:[#allocation6 + $0x188] ss:$16 sps:$4 sm:$0xff]  }
 0x186   :  { %723 = vmatprep.subr.bf16.mxu0 %v1920_v1  ;;  %v2011_v1 = vld [vmem:[#allocation6 + $0x1a8] ss:$16 sps:$4 sm:$0xff]  }
 0x189   :  { %724 = vmatpush1.bf16.msra.mxu0 %v1918_v2  ;;  %v2016_v2 = vld [vmem:[#allocation6 + $0x1cc] ss:$16 sps:$4 sm:$0xff]  }
 0x18a   :  { %725 = vmatprep.subr.bf16.mxu0 %v1923_v4  ;;  %v2019_v4 = vld [vmem:[#allocation6 + $0x1ec] ss:$16 sps:$4 sm:$0xff]  }
 0x18d   :  { %726 = vmatpush1.bf16.msra.mxu0 %v1921_v6  ;;  %v2017_v6 = vld [vmem:[#allocation6 + $0x1e8] ss:$16 sps:$4 sm:$0xff]  }
 0x18e   :  { %1754 = vmatprep.subr.bf16.mxu0 %v2020_v15  ;;  %v2037_v15 = vld [vmem:[#allocation7 + $0x80] sm:$0xff]  }
 0x190   :  { %728 = vmatmul.mubr.bf16.vlgmr.msra.gmra.mrb[4].mxu0 %v257_v9  ;;  %v2033_v9 = vld [vmem:[#allocation7 + $0x30] sm:$0xff]  }
 0x191   :  { %1755 = vmatpush3.bf16.msra.mxu0 %v2021_v16  ;;  %v2038_v16 = vld [vmem:[#allocation7 + $0xc8] sm:$0xff]  }
 0x192   :  { %1756 = vmatprep.subr.bf16.mxu0 %v2022_v17  ;;  %v2039_v17 = vld [vmem:[#allocation7 + $0x88] sm:$0xff]  }
 0x195   :  { %1757 = vmatpush3.bf16.msra.mxu0 %v2023_v18  ;;  %v2040_v18 = vld [vmem:[#allocation7 + $0xd0] sm:$0xff]  }
 0x196   :  { %1758 = vmatprep.subr.bf16.mxu0 %v2024_v19  ;;  %v2041_v19 = vld [vmem:[#allocation7 + $0x90] sm:$0xff]  }
 0x199   :  { %1759 = vmatpush3.bf16.msra.mxu0 %v2025_v20  ;;  %v2042_v20 = vld [vmem:[#allocation7 + $0xd8] sm:$0xff]  }
 0x19a   :  { %1760 = vmatprep.subr.bf16.mxu0 %v2026_v21  ;;  %v2043_v21 = vld [vmem:[#allocation7 + $0x98] sm:$0xff]  }
 0x19d   :  { %1761 = vmatpush3.bf16.msra.mxu0 %v2027_v22  ;;  %v2044_v22 = vld [vmem:[#allocation7 + $0xe0] sm:$0xff]  }
 0x19e   :  { %1762 = vmatprep.subr.bf16.mxu0 %v2028_v23  ;;  %v2045_v23 = vld [vmem:[#allocation7 + $0xa0] sm:$0xff]  }
 0x1a1   :  { %1763 = vmatpush3.bf16.msra.mxu0 %v2029_v24  ;;  %v2046_v24 = vld [vmem:[#allocation7 + $0xe8] sm:$0xff]  }
 0x1a2   :  { %1764 = vmatprep.subr.bf16.mxu0 %v2030_v25  ;;  %v2047_v25 = vld [vmem:[#allocation7 + $0xa8] sm:$0xff]  }
 0x1a5   :  { %1765 = vmatpush3.bf16.msra.mxu0 %v2031_v26  ;;  %v2048_v26 = vld [vmem:[#allocation7 + $0xf0] sm:$0xff]  }
 0x1a6   :  { %1766 = vmatprep.subr.bf16.mxu0 %v2032_v7 }
 0x1a9   :  { %1767 = vmatpush3.bf16.msra.mxu0 %v2033_v9 }
 0x1aa   :  { %1768 = vmatprep.subr.bf16.mxu0 %v2034_v12 }
 0x1ad   :  { %1769 = vmatpush3.bf16.msra.mxu0 %v2035_v13 }
 0x263   :  { %v729_v30 = vpop.f32.mrb[4].mxu0 }
 0x264   :  { %v1798_v31 = vadd.f32 %v729_v30, %v327_v28  ;;  %v731_v32 = vpop.f32.mrb[5].mxu0  ;;  %v2050_v28 = vld [vmem:[#allocation7 + $0xf8] sm:$0xff]   ;;  %v92_v30 = vld [vmem:[#allocation9 + $0x6] sm:$0xf] }
 0x265   :  { %v1799_v33 = vadd.f32 %v731_v32, %v331_v29  ;;  %v733_v34 = vpop.f32.mrb[6].mxu0  ;;  %v2051_v29 = vld [vmem:[#allocation7 + $0xb8] sm:$0xff]   ;;  %v810_v32 = vrot.slane %v92_v30, %v2301_v11 }
 0x266   :  { %v734_v35 = vpop.f32.mrb[7].mxu0  ;;  %v2320_v38 = vpack.c.bf16 %v1798_v31, %v1798_v31  ;;  %v806_v31 = vrot.slane %v92_v30, %v2296_v8  ;;  %v818_v8 = vrot.slane %v92_v30, %v119_v14 }
 0x267   :  { %v737_v36 = vpack.c.bf16 %v1799_v33, %v1799_v33 }
 0x269   :  { %1175 = vmatprep.mubr.bf16.mxu1 %v737_v36 }
 0x26a   :  { %1176 = vmatmul.mubr.bf16.vlgmr.msra.gmra.mrb[4].mxu1 %v2320_v38 }
 0x26b   :  { %1185 = vmatpush1.bf16.msra.mxu1 %v1972_v37  ;;  %1216 = vmatprep.mubr.bf16.mxu1 %v737_v36 }
 0x26c   :  { %1186 = vmatprep.subr.bf16.mxu1 %v1977_v39 }
 0x26f   :  { %1187 = vmatpush1.bf16.msra.mxu1 %v1975_v40 }
 0x270   :  { %1188 = vmatprep.subr.bf16.mxu1 %v1980_v41 }
 0x273   :  { %1189 = vmatpush1.bf16.msra.mxu1 %v1978_v42 }
 0x274   :  { %1190 = vmatprep.subr.bf16.mxu1 %v1983_v43  ;;  %v814_v43 = vrot.slane %v92_v30, %v115_v61 }
 0x277   :  { %1191 = vmatpush1.bf16.msra.mxu1 %v1981_v44 }
 0x278   :  { %1192 = vmatprep.subr.bf16.mxu1 %v1986_v45 }
 0x27b   :  { %1193 = vmatpush1.bf16.msra.mxu1 %v1984_v46 }
 0x27c   :  { %1194 = vmatprep.subr.bf16.mxu1 %v1989_v47 }
 0x27f   :  { %1195 = vmatpush1.bf16.msra.mxu1 %v1987_v48 }
 0x280   :  { %1196 = vmatprep.subr.bf16.mxu1 %v1992_v49 }
 0x283   :  { %1197 = vmatpush1.bf16.msra.mxu1 %v1990_v50 }
 0x284   :  { %1198 = vmatprep.subr.bf16.mxu1 %v1995_v51 }
 0x287   :  { %1199 = vmatpush1.bf16.msra.mxu1 %v1993_v52 }
 0x288   :  { %1200 = vmatprep.subr.bf16.mxu1 %v1998_v53 }
 0x28b   :  { %1201 = vmatpush1.bf16.msra.mxu1 %v1996_v54 }
 0x28c   :  { %1202 = vmatprep.subr.bf16.mxu1 %v2001_v55 }
 0x28f   :  { %1203 = vmatpush1.bf16.msra.mxu1 %v1999_v56 }
 0x290   :  { %1204 = vmatprep.subr.bf16.mxu1 %v2004_v57  ;;  %v1721_v57 = vld [vmem:[#allocation9 + $0xa] ss:$0 sm:$0xff] }
 0x293   :  { %1205 = vmatpush1.bf16.msra.mxu1 %v2002_v58 }
 0x294   :  { %1206 = vmatprep.subr.bf16.mxu1 %v2007_v59 }
 0x297   :  { %1207 = vmatpush1.bf16.msra.mxu1 %v2005_v60 }
 0x298   :  { %1208 = vmatprep.subr.bf16.mxu1 %v2010_v62 }
 0x29b   :  { %1209 = vmatpush1.bf16.msra.mxu1 %v2008_v63 }
 0x29c   :  { %1210 = vmatprep.subr.bf16.mxu1 %v2013_v0 }
 0x29f   :  { %1211 = vmatpush1.bf16.msra.mxu1 %v2011_v1 }
 0x2a0   :  { %1212 = vmatprep.subr.bf16.mxu1 %v2016_v2 }
 0x2a3   :  { %1213 = vmatpush1.bf16.msra.mxu1 %v2014_v3 }
 0x2a4   :  { %1214 = vmatprep.subr.bf16.mxu1 %v2019_v4 }
 0x2a7   :  { %1215 = vmatpush1.bf16.msra.mxu1 %v2017_v6 }
 0x2a8   :  { %1776 = vmatprep.subr.bf16.mxu1 %v2036_v10 }
 0x2aa   :  { %1217 = vmatmul.mubr.bf16.vlgmr.msra.gmra.mrb[8].mxu1 %v2320_v38 }
 0x2ab   :  { %1777 = vmatpush3.bf16.msra.mxu1 %v2037_v15 }
 0x2ac   :  { %1778 = vmatprep.subr.bf16.mxu1 %v2038_v16 }
 0x2af   :  { %1779 = vmatpush3.bf16.msra.mxu1 %v2039_v17 }
 0x2b0   :  { %1780 = vmatprep.subr.bf16.mxu1 %v2040_v18 }
 0x2b3   :  { %1781 = vmatpush3.bf16.msra.mxu1 %v2041_v19 }
 0x2b4   :  { %1782 = vmatprep.subr.bf16.mxu1 %v2042_v20 }
 0x2b7   :  { %1783 = vmatpush3.bf16.msra.mxu1 %v2043_v21 }
 0x2b8   :  { %1784 = vmatprep.subr.bf16.mxu1 %v2044_v22 }
 0x2bb   :  { %1785 = vmatpush3.bf16.msra.mxu1 %v2045_v23 }
 0x2bc   :  { %1786 = vmatprep.subr.bf16.mxu1 %v2046_v24 }
 0x2bf   :  { %1787 = vmatpush3.bf16.msra.mxu1 %v2047_v25 }
 0x2c0   :  { %1788 = vmatprep.subr.bf16.mxu1 %v2048_v26 }
 0x2c3   :  { %1789 = vmatpush3.bf16.msra.mxu1 %v2049_v27 }
 0x2c4   :  { %1790 = vmatprep.subr.bf16.mxu1 %v2050_v28 }
 0x2c7   :  { %1791 = vmatpush3.bf16.msra.mxu1 %v2051_v29 }
 0x33d   :  { %v1177_v33 = vpop.f32.mrb[4].mxu1 }
 0x33e   :  { %v1178_v34 = vadd.f32 %v1177_v33, %v806_v31  ;;  %v1179_v35 = vpop.f32.mrb[5].mxu1 }
 0x33f   :  { %v1180_v36 = vadd.f32 %v1179_v35, %v810_v32  ;;  %v1181_v37 = vpop.f32.mrb[6].mxu1 }
 0x340   :  { %v1225_v38 = vmax.f32 %v1178_v34, 0.0  ;;  %v1182_v39 = vpop.f32.mrb[7].mxu1 }
 0x341   :  { %v1226_v40 = vmax.f32 %v1180_v36, 0.0 }
 0x342   :  { %v1229_v42 = vpack.c.bf16 %v1225_v38, %v1225_v38 }
 0x343   :  { %v1230_v41 = vpack.c.bf16 %v1226_v40, %v1226_v40 }
 0x345   :  { %1527 = vmatprep.mubr.bf16.mxu0 %v1230_v41 }
 0x346   :  { %1528 = vmatmul.mubr.bf16.vlgmr.msra.gmra.mrb[8].mxu0 %v1229_v42 }
 0x37d   :  { %v1218_v44 = vpop.f32.mrb[8].mxu1 }
 0x37e   :  { %v1219_v11 = vadd.f32 %v1218_v44, %v814_v43  ;;  %v1220_v45 = vpop.f32.mrb[9].mxu1 }
 0x37f   :  { %v1221_v46 = vadd.f32 %v1220_v45, %v818_v8  ;;  %v1222_v47 = vpop.f32.mrb[10].mxu1 }
 0x380   :  { %v1227_v48 = vmax.f32 %v1219_v11, 0.0  ;;  %v1223_v49 = vpop.f32.mrb[11].mxu1 }
 0x381   :  { %v1228_v50 = vmax.f32 %v1221_v46, 0.0 }
 0x382   :  { %v1231_v52 = vpack.c.bf16 %v1227_v48, %v1227_v48 }
 0x383   :  { %v1232_v51 = vpack.c.bf16 %v1228_v50, %v1228_v50 }
 0x385   :  { %1567 = vmatprep.mubr.bf16.mxu1 %v1232_v51 }
 0x386   :  { %1568 = vmatmul.mubr.bf16.vlgmr.msra.gmra.mrb[12].mxu1 %v1231_v52 }
 0x419   :  { %v1770_v53 = vpop.f32.mrb[8].mxu0 }
 0x41a   :  { %v1771_v54 = vpop.f32.mrb[9].mxu0 }
 0x41b   :  { %v1772_v55 = vadd.f32 %v1771_v54, %v1770_v53  ;;  %v1773_v56 = vpop.f32.mrb[10].mxu0 }
 0x41c   :  { %v1774_v61 = vpop.f32.mrb[11].mxu0 }
 0x41d   :  { %v1530_v58 = vadd.f32 %v1772_v55, %v1721_v57 }
 0x459   :  { %v1792_v5 = vpop.f32.mrb[12].mxu1 }
 0x45a   :  { %v1793_v14 = vpop.f32.mrb[13].mxu1 }
 0x45b   :  { %v1794_v59 = vadd.f32 %v1793_v14, %v1792_v5  ;;  %v1795_v60 = vpop.f32.mrb[14].mxu1 }
 0x45c   :  { %v1796_v62 = vpop.f32.mrb[15].mxu1 }
 0x45d   :  { %v1570_v63 = vadd.f32 %v1794_v59, %v1530_v58 }
 0x45f   :  { %1575 = vst [vmem:[%s2339_s6] sm:$0xff] %v1570_v63 }
 0x460   :  { %1580 = vsyncpa [#allocation3], 1 }
 0x461   :  { %1581 = vsyncpa [#allocation5], 1 }
 0x462   :  { %1582 = vsyncpa [#allocation8], 1 }

</bundles_post_ra>
